<compile_context>
chip_gen: v7x
topology: tpu7x:2x2x1
jax: 0.10.0
libtpu: 0.0.40
codegen_flags: <defaults>
</compile_context>

<pallas_src>
import jax
import jax.numpy as jnp
from jax import lax
from jax.experimental import pallas as pl
from jax.experimental.pallas import tpu as pltpu

F_IN = 200
_DIMS = (200, 128, 64, 32, 16, 1)


def _round_up(n, m):
    return ((n + m - 1) // m) * m


def _mlp_kernel(x_ref,
                w1_ref, b1_ref,
                w2_ref, b2_ref,
                w3_ref, b3_ref,
                w4_ref, b4_ref,
                w5_ref, b5_ref,
                o_ref):
    # Layer 1: 200 -> 128, ReLU. bf16 cast happens in-kernel so the wrapper
    # never materializes a padded/cast copy of x. f32 accumulation throughout.
    x = x_ref[...].astype(jnp.bfloat16)
    h = jnp.dot(x, w1_ref[...], preferred_element_type=jnp.float32)
    h = jnp.maximum(h + b1_ref[...], 0.0)
    # Layer 2: 128 -> 64, ReLU
    h = jnp.dot(h.astype(jnp.bfloat16), w2_ref[...],
                preferred_element_type=jnp.float32)
    h = jnp.maximum(h + b2_ref[...], 0.0)
    # Layer 3: 64 -> 32, ReLU
    h = jnp.dot(h.astype(jnp.bfloat16), w3_ref[...],
                preferred_element_type=jnp.float32)
    h = jnp.maximum(h + b3_ref[...], 0.0)
    # Layer 4: 32 -> 16, ReLU
    h = jnp.dot(h.astype(jnp.bfloat16), w4_ref[...],
                preferred_element_type=jnp.float32)
    h = jnp.maximum(h + b4_ref[...], 0.0)              # (tb, 16) f32
    # Layer 5: 16 -> 1, no activation.  Computed as W5_blk @ h^T on the MXU
    # (the MXU has plenty of slack here) so the result already has the batch
    # on lanes: the store is a dense (1, tb) row, not a masked (tb, 1) column.
    # w5_ref is (8, 16): row 0 is the real weight row, rows 1..7 are zeros.
    out8 = lax.dot_general(w5_ref[...], h.astype(jnp.bfloat16),
                           (((1,), (1,)), ((), ())),
                           preferred_element_type=jnp.float32)   # (8, tb)
    out_row = out8[0:1, :] + b5_ref[...]                          # (1, tb)
    o_ref[...] = out_row.astype(o_ref.dtype)


def _pick_tile(batch, tile_b):
    """One block for small batches; otherwise a 128-multiple tile with at
    least 2 grid steps (keeps both v7x TensorCores busy)."""
    if batch <= 2048:
        return batch
    tb = min(tile_b, _round_up(pl.cdiv(batch, 2), 128))
    return _round_up(tb, 128)


def regressor_forward(x, params, tile_b=4096):
    """x: (B, 200) float32.  params: list of (W_t, b) with W_t of shape
    (in, out) and b of shape (1, out), float32.  Returns (B, 1) float32.

    tile_b: batch rows per grid step. 4096 is safe on all generations with
    the 32 MiB VMEM limit below; sweep up to 8192 on v6e/v7x.
    """
    B, F = x.shape
    assert F == F_IN, F

    (w1, b1), (w2, b2), (w3, b3), (w4, b4), (w5, b5) = params

    # MXU-layer weights in bf16 (f32 accumulation in-kernel).
    w1b = w1.astype(jnp.bfloat16)
    w2b = w2.astype(jnp.bfloat16)
    w3b = w3.astype(jnp.bfloat16)
    w4b = w4.astype(jnp.bfloat16)
    # Final layer stored as an (8, 16) row-block (row 0 real, rows 1..7 zero)
    # so the in-kernel A @ B^T matmul has a full sublane tile.
    w5_blk = jnp.pad(w5.reshape(1, -1), ((0, 7), (0, 0))).astype(jnp.bfloat16)
    b5_2d = b5.reshape(1, 1).astype(jnp.float32)

    flat = [w1b, b1, w2b, b2, w3b, b3, w4b, b4, w5_blk, b5_2d]

    tb = _pick_tile(B, tile_b)
    grid = (pl.cdiv(B, tb),)   # ragged tail handled by Pallas block masking

    def invariant_spec(a):
        # Full-array block, same block every step -> stays VMEM-resident.
        return pl.BlockSpec(a.shape, lambda i: (0, 0))

    in_specs = ([pl.BlockSpec((tb, F_IN), lambda i: (i, 0))]
                + [invariant_spec(a) for a in flat])
    # Lane-dense output: (1, B) row, one (1, tb) block per grid step.
    out_spec = pl.BlockSpec((1, tb), lambda i: (0, i))

    flops = 2 * B * sum(_DIMS[i] * _DIMS[i + 1] for i in range(len(_DIMS) - 1))
    param_bytes = sum(int(a.size) * a.dtype.itemsize for a in flat)
    cost = pl.CostEstimate(
        flops=flops, transcendentals=0,
        bytes_accessed=int(x.size) * x.dtype.itemsize + 4 * B + param_bytes)

    out = pl.pallas_call(
        _mlp_kernel,
        out_shape=jax.ShapeDtypeStruct((1, B), jnp.float32),
        grid=grid,
        in_specs=in_specs,
        out_specs=out_spec,
        compiler_params=pltpu.CompilerParams(
            dimension_semantics=("parallel",),
            vmem_limit_bytes=32 * 1024 * 1024),
        cost_estimate=cost,
    )(x, *flat)

    return out.reshape(B, 1)


def init_params(key):
    """Deterministic parameter init matching the PyTorch module's shapes.
    PyTorch Linear weight is (out, in); we store the transpose (in, out)."""
    params = []
    for i in range(len(_DIMS) - 1):
        fan_in, fan_out = _DIMS[i], _DIMS[i + 1]
        key, kw, kb = jax.random.split(key, 3)
        bound = 1.0 / jnp.sqrt(fan_in)
        w = jax.random.uniform(kw, (fan_out, fan_in), jnp.float32, -bound, bound)
        b = jax.random.uniform(kb, (1, fan_out), jnp.float32, -bound, bound)
        params.append((w.T, b))  # store as (in, out)
    return params


def reference_forward(x, params):
    h = x
    for i, (w_t, b) in enumerate(params):
        h = h @ w_t + b
        if i < len(params) - 1:
            h = jnp.maximum(h, 0.0)
    return h


if __name__ == "__main__":
    key = jax.random.PRNGKey(0)
    k_x, k_p = jax.random.split(key)

    B = 64  # small demo batch; the kernel tiles arbitrary B
    x = jax.random.normal(k_x, (B, F_IN), jnp.float32)
    params = init_params(k_p)

    out = regressor_forward(x, params)
    out = jax.block_until_ready(out)

    ref = reference_forward(x, params)
    assert out.shape == (B, 1), out.shape
    # bf16 matmul inputs (f32 accumulation) -> looser tolerance than pure f32.
    assert jnp.allclose(out, ref, atol=5e-2, rtol=5e-2), (out, ref)

    print("KERNEL_OK")
</pallas_src>

<mosaic_0001>
module attributes {stable_mosaic.version = 11 : i64} {
  func.func @_mlp_kernel(%arg0: i32, %arg1: memref<64x200xf32, #tpu.memory_space<vmem>>, %arg2: memref<200x128xbf16, #tpu.memory_space<vmem>>, %arg3: memref<1x128xf32, #tpu.memory_space<vmem>>, %arg4: memref<128x64xbf16, #tpu.memory_space<vmem>>, %arg5: memref<1x64xf32, #tpu.memory_space<vmem>>, %arg6: memref<64x32xbf16, #tpu.memory_space<vmem>>, %arg7: memref<1x32xf32, #tpu.memory_space<vmem>>, %arg8: memref<32x16xbf16, #tpu.memory_space<vmem>>, %arg9: memref<1x16xf32, #tpu.memory_space<vmem>>, %arg10: memref<8x16xbf16, #tpu.memory_space<vmem>>, %arg11: memref<1x1xf32, #tpu.memory_space<vmem>>, %arg12: memref<1x64xf32, #tpu.memory_space<vmem>>) attributes {dimension_semantics = [#tpu.dimension_semantics<parallel>], iteration_bounds = array<i64: 1>, scalar_prefetch = 0 : i64, scratch_operands = 0 : i64, tpu.core_type = #tpu.core_type<tc>, window_params = [{transform_indices = @transform_0, window_bounds = array<i64: 64, 200>}, {pipeline_mode = #tpu.pipeline_mode<synchronous>, transform_indices = @transform_1, window_bounds = array<i64: 200, 128>}, {pipeline_mode = #tpu.pipeline_mode<synchronous>, transform_indices = @transform_2, window_bounds = array<i64: 1, 128>}, {pipeline_mode = #tpu.pipeline_mode<synchronous>, transform_indices = @transform_3, window_bounds = array<i64: 128, 64>}, {pipeline_mode = #tpu.pipeline_mode<synchronous>, transform_indices = @transform_4, window_bounds = array<i64: 1, 64>}, {pipeline_mode = #tpu.pipeline_mode<synchronous>, transform_indices = @transform_5, window_bounds = array<i64: 64, 32>}, {pipeline_mode = #tpu.pipeline_mode<synchronous>, transform_indices = @transform_6, window_bounds = array<i64: 1, 32>}, {pipeline_mode = #tpu.pipeline_mode<synchronous>, transform_indices = @transform_7, window_bounds = array<i64: 32, 16>}, {pipeline_mode = #tpu.pipeline_mode<synchronous>, transform_indices = @transform_8, window_bounds = array<i64: 1, 16>}, {pipeline_mode = #tpu.pipeline_mode<synchronous>, transform_indices = @transform_9, window_bounds = array<i64: 8, 16>}, {pipeline_mode = #tpu.pipeline_mode<synchronous>, transform_indices = @transform_10, window_bounds = array<i64: 1, 1>}, {transform_indices = @transform_11, window_bounds = array<i64: 1, 64>}]} {
    %c0 = arith.constant 0 : index
    %c0_0 = arith.constant 0 : index
    %0 = vector.load %arg1[%c0, %c0_0] : memref<64x200xf32, #tpu.memory_space<vmem>>, vector<64x200xf32>
    %1 = arith.truncf %0 : vector<64x200xf32> to vector<64x200xbf16>
    %c0_1 = arith.constant 0 : index
    %c0_2 = arith.constant 0 : index
    %2 = vector.load %arg2[%c0_1, %c0_2] : memref<200x128xbf16, #tpu.memory_space<vmem>>, vector<200x128xbf16>
    %cst = arith.constant dense<0.000000e+00> : vector<64x128xf32>
    %3 = tpu.matmul %1, %2, %cst {dimension_numbers = #tpu.dot_dimension_numbers<[1], [0], [0], [1], [0, 0, 1, 1], [], []>} : vector<64x200xbf16>, vector<200x128xbf16>, vector<64x128xf32> -> vector<64x128xf32>
    %c0_3 = arith.constant 0 : index
    %c0_4 = arith.constant 0 : index
    %4 = vector.load %arg3[%c0_3, %c0_4] : memref<1x128xf32, #tpu.memory_space<vmem>>, vector<1x128xf32>
    %5 = vector.broadcast %4 : vector<1x128xf32> to vector<64x128xf32>
    %6 = arith.addf %3, %5 : vector<64x128xf32>
    %cst_5 = arith.constant 0.000000e+00 : f32
    %7 = vector.broadcast %cst_5 : f32 to vector<64x128xf32>
    %8 = arith.maximumf %6, %7 : vector<64x128xf32>
    %9 = arith.truncf %8 : vector<64x128xf32> to vector<64x128xbf16>
    %c0_6 = arith.constant 0 : index
    %c0_7 = arith.constant 0 : index
    %10 = vector.load %arg4[%c0_6, %c0_7] : memref<128x64xbf16, #tpu.memory_space<vmem>>, vector<128x64xbf16>
    %cst_8 = arith.constant dense<0.000000e+00> : vector<64x64xf32>
    %11 = tpu.matmul %9, %10, %cst_8 {dimension_numbers = #tpu.dot_dimension_numbers<[1], [0], [0], [1], [0, 0, 1, 1], [], []>} : vector<64x128xbf16>, vector<128x64xbf16>, vector<64x64xf32> -> vector<64x64xf32>
    %c0_9 = arith.constant 0 : index
    %c0_10 = arith.constant 0 : index
    %12 = vector.load %arg5[%c0_9, %c0_10] : memref<1x64xf32, #tpu.memory_space<vmem>>, vector<1x64xf32>
    %13 = vector.broadcast %12 : vector<1x64xf32> to vector<64x64xf32>
    %14 = arith.addf %11, %13 : vector<64x64xf32>
    %cst_11 = arith.constant 0.000000e+00 : f32
    %15 = vector.broadcast %cst_11 : f32 to vector<64x64xf32>
    %16 = arith.maximumf %14, %15 : vector<64x64xf32>
    %17 = arith.truncf %16 : vector<64x64xf32> to vector<64x64xbf16>
    %c0_12 = arith.constant 0 : index
    %c0_13 = arith.constant 0 : index
    %18 = vector.load %arg6[%c0_12, %c0_13] : memref<64x32xbf16, #tpu.memory_space<vmem>>, vector<64x32xbf16>
    %cst_14 = arith.constant dense<0.000000e+00> : vector<64x32xf32>
    %19 = tpu.matmul %17, %18, %cst_14 {dimension_numbers = #tpu.dot_dimension_numbers<[1], [0], [0], [1], [0, 0, 1, 1], [], []>} : vector<64x64xbf16>, vector<64x32xbf16>, vector<64x32xf32> -> vector<64x32xf32>
    %c0_15 = arith.constant 0 : index
    %c0_16 = arith.constant 0 : index
    %20 = vector.load %arg7[%c0_15, %c0_16] : memref<1x32xf32, #tpu.memory_space<vmem>>, vector<1x32xf32>
    %21 = vector.broadcast %20 : vector<1x32xf32> to vector<64x32xf32>
    %22 = arith.addf %19, %21 : vector<64x32xf32>
    %cst_17 = arith.constant 0.000000e+00 : f32
    %23 = vector.broadcast %cst_17 : f32 to vector<64x32xf32>
    %24 = arith.maximumf %22, %23 : vector<64x32xf32>
    %25 = arith.truncf %24 : vector<64x32xf32> to vector<64x32xbf16>
    %c0_18 = arith.constant 0 : index
    %c0_19 = arith.constant 0 : index
    %26 = vector.load %arg8[%c0_18, %c0_19] : memref<32x16xbf16, #tpu.memory_space<vmem>>, vector<32x16xbf16>
    %cst_20 = arith.constant dense<0.000000e+00> : vector<64x16xf32>
    %27 = tpu.matmul %25, %26, %cst_20 {dimension_numbers = #tpu.dot_dimension_numbers<[1], [0], [0], [1], [0, 0, 1, 1], [], []>} : vector<64x32xbf16>, vector<32x16xbf16>, vector<64x16xf32> -> vector<64x16xf32>
    %c0_21 = arith.constant 0 : index
    %c0_22 = arith.constant 0 : index
    %28 = vector.load %arg9[%c0_21, %c0_22] : memref<1x16xf32, #tpu.memory_space<vmem>>, vector<1x16xf32>
    %29 = vector.broadcast %28 : vector<1x16xf32> to vector<64x16xf32>
    %30 = arith.addf %27, %29 : vector<64x16xf32>
    %cst_23 = arith.constant 0.000000e+00 : f32
    %31 = vector.broadcast %cst_23 : f32 to vector<64x16xf32>
    %32 = arith.maximumf %30, %31 : vector<64x16xf32>
    %c0_24 = arith.constant 0 : index
    %c0_25 = arith.constant 0 : index
    %33 = vector.load %arg10[%c0_24, %c0_25] : memref<8x16xbf16, #tpu.memory_space<vmem>>, vector<8x16xbf16>
    %34 = arith.truncf %32 : vector<64x16xf32> to vector<64x16xbf16>
    %cst_26 = arith.constant dense<0.000000e+00> : vector<8x64xf32>
    %35 = tpu.matmul %33, %34, %cst_26 {dimension_numbers = #tpu.dot_dimension_numbers<[1], [1], [0], [0], [0, 0, 1, 0], [], []>} : vector<8x16xbf16>, vector<64x16xbf16>, vector<8x64xf32> -> vector<8x64xf32>
    %36 = vector.extract_strided_slice %35 {offsets = [0, 0], sizes = [1, 64], strides = [1, 1]} : vector<8x64xf32> to vector<1x64xf32>
    %c0_27 = arith.constant 0 : index
    %c0_28 = arith.constant 0 : index
    %37 = vector.load %arg11[%c0_27, %c0_28] : memref<1x1xf32, #tpu.memory_space<vmem>>, vector<1x1xf32>
    %38 = vector.broadcast %37 : vector<1x1xf32> to vector<1x64xf32>
    %39 = arith.addf %36, %38 : vector<1x64xf32>
    %c0_29 = arith.constant 0 : index
    %c0_30 = arith.constant 0 : index
    %40 = vector.load %arg12[%c0_29, %c0_30] : memref<1x64xf32, #tpu.memory_space<vmem>>, vector<1x64xf32>
    tpu.vector_store %arg12[%c0_29, %c0_30], %39 {strides = array<i32>} : memref<1x64xf32, #tpu.memory_space<vmem>>, vector<1x64xf32>,
    return
  }
  func.func @transform_0(%arg0: i32) -> (i32, i32) {
    %c0_i32 = arith.constant 0 : i32
    %c0_i32_0 = arith.constant 0 : i32
    return %arg0, %c0_i32 : i32, i32
  }
  func.func @transform_1(%arg0: i32) -> (i32, i32) {
    %c0_i32 = arith.constant 0 : i32
    %c0_i32_0 = arith.constant 0 : i32
    %c0_i32_1 = arith.constant 0 : i32
    return %c0_i32, %c0_i32_0 : i32, i32
  }
  func.func @transform_2(%arg0: i32) -> (i32, i32) {
    %c0_i32 = arith.constant 0 : i32
    %c0_i32_0 = arith.constant 0 : i32
    %c0_i32_1 = arith.constant 0 : i32
    return %c0_i32, %c0_i32_0 : i32, i32
  }
  func.func @transform_3(%arg0: i32) -> (i32, i32) {
    %c0_i32 = arith.constant 0 : i32
    %c0_i32_0 = arith.constant 0 : i32
    %c0_i32_1 = arith.constant 0 : i32
    return %c0_i32, %c0_i32_0 : i32, i32
  }
  func.func @transform_4(%arg0: i32) -> (i32, i32) {
    %c0_i32 = arith.constant 0 : i32
    %c0_i32_0 = arith.constant 0 : i32
    %c0_i32_1 = arith.constant 0 : i32
    return %c0_i32, %c0_i32_0 : i32, i32
  }
  func.func @transform_5(%arg0: i32) -> (i32, i32) {
    %c0_i32 = arith.constant 0 : i32
    %c0_i32_0 = arith.constant 0 : i32
    %c0_i32_1 = arith.constant 0 : i32
    return %c0_i32, %c0_i32_0 : i32, i32
  }
  func.func @transform_6(%arg0: i32) -> (i32, i32) {
    %c0_i32 = arith.constant 0 : i32
    %c0_i32_0 = arith.constant 0 : i32
    %c0_i32_1 = arith.constant 0 : i32
    return %c0_i32, %c0_i32_0 : i32, i32
  }
  func.func @transform_7(%arg0: i32) -> (i32, i32) {
    %c0_i32 = arith.constant 0 : i32
    %c0_i32_0 = arith.constant 0 : i32
    %c0_i32_1 = arith.constant 0 : i32
    return %c0_i32, %c0_i32_0 : i32, i32
  }
  func.func @transform_8(%arg0: i32) -> (i32, i32) {
    %c0_i32 = arith.constant 0 : i32
    %c0_i32_0 = arith.constant 0 : i32
    %c0_i32_1 = arith.constant 0 : i32
    return %c0_i32, %c0_i32_0 : i32, i32
  }
  func.func @transform_9(%arg0: i32) -> (i32, i32) {
    %c0_i32 = arith.constant 0 : i32
    %c0_i32_0 = arith.constant 0 : i32
    %c0_i32_1 = arith.constant 0 : i32
    return %c0_i32, %c0_i32_0 : i32, i32
  }
  func.func @transform_10(%arg0: i32) -> (i32, i32) {
    %c0_i32 = arith.constant 0 : i32
    %c0_i32_0 = arith.constant 0 : i32
    %c0_i32_1 = arith.constant 0 : i32
    return %c0_i32, %c0_i32_0 : i32, i32
  }
  func.func @transform_11(%arg0: i32) -> (i32, i32) {
    %c0_i32 = arith.constant 0 : i32
    %c0_i32_0 = arith.constant 0 : i32
    return %c0_i32, %arg0 : i32, i32
  }
}

</mosaic_0001>

<bundles_post_ra>
// kernel: tpu_custom_call.1
= control target key start
LH: loop header
LB: loop body
LE: loop exit
PB: predicated region body
PF: predicated region fallthrough
CT: control target
= control target key end

     0   :  { %s1194_s0 = inlined_call_operand.vmem [shape: f32[64,200], index: 0, kind: input, shape index: {}]   ;;  %s1195_s1 = inlined_call_operand.hbm [shape: bf16[200,128], index: 1, kind: input, shape index: {}]   ;;  %s1196_s2 = inlined_call_operand.vmem [shape: f32[1,128], index: 2, kind: input, shape index: {}]   ;;  %s1197_s3 = inlined_call_operand.vmem [shape: bf16[128,64], index: 3, kind: input, shape index: {}]   ;;  %s1198_s4 = inlined_call_operand.vmem [shape: f32[1,64], index: 4, kind: input, shape index: {}]   ;;  %s1199_s5 = inlined_call_operand.vmem [shape: bf16[64,32], index: 5, kind: input, shape index: {}]   ;;  %s1200_s6 = inlined_call_operand.vmem [shape: f32[1,32], index: 6, kind: input, shape index: {}]   ;;  %s1201_s7 = inlined_call_operand.vmem [shape: bf16[32,16], index: 7, kind: input, shape index: {}]   ;;  %s1202_s8 = inlined_call_operand.vmem [shape: f32[1,16], index: 8, kind: input, shape index: {}]   ;;  %s1203_s9 = inlined_call_operand.vmem [shape: bf16[8,16], index: 9, kind: input, shape index: {}]   ;;  %s1204_s10 = inlined_call_operand.<no memory space> [shape: f32[1,1], index: 10, kind: input, shape index: {}]   ;;  %s1205_s11 = inlined_call_operand.hbm [shape: f32[1,64], index: 11, kind: output, shape index: {}]  }
   0x1   :  { %v16_v0 = vstv %s1204_s10 }
   0x2   :  { %17 = vst [vmem:[#allocation2] sm:$0x1] %v16_v0 }
   0x3   :  { %18 = vsyncpa [#allocation4], 0 }
   0x4   :  { %19 = vsyncpa [#allocation5], 0  ;;  %s978_s19 = smov [#allocation3]   ;;  %s930_s23 = scalar_lea.hbm %s1195_s1, 1600 }
   0x5   :  { %s27_s20 = sshll.u32 %s978_s19, 4  ;;  %p931_p0 = scmp.ne.s32.totalorder %s1195_s1, %s930_s23  ;;  %s28_s20 = int_to_ptr.vmem [resolvable:$true] %s27_s20 }
   0x6   :  { %p934_p1 = scmp.lt.u32.totalorder %s930_s23, %s1195_s1 }
   0x8   :  { %p936_p2 = pnand %p934_p1, %p931_p0 }
   0xa   :  { %939 = shalt.err (!%p936_p2)
}
   0xb   :  { %s940_s10 = scalar_lea.vmem %s28_s20, 1600  ;;  %p945_p4 = scmp.lt.s32.totalorder %s28_s20, %s28_s20 }
   0xc   :  { %p941_p3 = scmp.ne.s32.totalorder %s28_s20, %s940_s10  ;;  %p946_p5 = scmp.lt.s32.totalorder %s940_s10, %s940_s10 }
   0xe   :  { %p947_p6 = por %p946_p5, %p945_p4 }
  0x10   :  { %p948_p7 = pnand %p947_p6, %p941_p3 }
  0x12   :  { %951 = shalt.err (!%p948_p7)
}
  0x13   :  { %s979_s28 = smov 64   ;;  %s980_s29 = smov 4  }
  0x14   :  { %33 = dma.hbm_to_vmem [thread:$0]  %s1195_s1, 1600, %s28_s20, [#allocation4], %s979_s28, %s979_s28, %s980_s29  }
  0x15   :  { %974 = dma.done.wait [#allocation4], 1600  }
  0x16   :  { %975 = vsyncadd [#allocation4], 4294965696  ;;  %v981_v1 = vmov 0   ;;  %v903_v2 = vld [vmem:[#allocation3] sm:$0xff]   ;;  %v904_v3 = vld [vmem:[#allocation3 + $0x8] sm:$0xff]   ;;  %vm187_vm0 = vcmask 588800  }
  0x17   :  { %204 = vmatprep.subr.bf16.mxu0 %v981_v1  ;;  %902 = vset.pattern.permute.xlu0 %v981_v1  ;;  %v905_v4 = vld [vmem:[#allocation3 + $0x10] sm:$0xff]   ;;  %v906_v5 = vld [vmem:[#allocation3 + $0x18] sm:$0xff]   ;;  %v57_v6 = vld [vmem:[%s1194_s0 + $0x8] sm:$0xff]  ;;  %vm200_vm1 = vcmask 1043456   ;;  %vm468_vm2 = vcmask 523264   ;;  %vm581_vm3 = vcmask 261120  }
  0x18   :  { %205 = vmatpush1.bf16.msra.mxu0 %v903_v2  ;;  %v59_v7 = vld [vmem:[%s1194_s0 + $0x18] sm:$0xff]  ;;  %v907_v8 = vld [vmem:[#allocation3 + $0x20] sm:$0xff]   ;;  %v908_v10 = vld [vmem:[#allocation3 + $0x28] sm:$0xff]   ;;  %vm983_vm4 = vmmov 0   ;;  %vm672_vm5 = vcmask 130048   ;;  %s984_s12 = smov [#allocation6]  }
  0x19   :  { %206 = vmatprep.subr.bf16.mxu0 %v981_v1  ;;  %v73_v9 = vpack.c.bf16 %v59_v7, %v57_v6  ;;  %v916_v11 = vld [vmem:[%s1197_s3] sm:$0xff]   ;;  %v917_v12 = vld [vmem:[%s1197_s3 + $0x8] sm:$0xff]   ;;  %v909_v13 = vld [vmem:[#allocation3 + $0x30] sm:$0xff]   ;;  %s747_s13 = sshll.u32 %s984_s12, 4  ;;  %vm739_vm6 = vcmask 516096   ;;  %s748_s13 = int_to_ptr.vmem [resolvable:$true] %s747_s13 }
  0x1a   :  { %831 = vmatprep.subr.bf16.mxu1 %v916_v11  ;;  %v918_v14 = vld [vmem:[%s1197_s3 + $0x10] sm:$0xff]   ;;  %v910_v15 = vld [vmem:[#allocation3 + $0x38] sm:$0xff]   ;;  %v911_v17 = vld [vmem:[#allocation3 + $0x40] sm:$0xff]   ;;  %s952_s14 = scalar_lea.vmem %s748_s13, 16  ;;  %p957_p9 = scmp.lt.s32.totalorder %s748_s13, %s748_s13 }
  0x1b   :  { %770 = vmatprep.mubr.msk.bf16.mxu0 %vm187_vm0, %v73_v9  ;;  %832 = vmatpush3.bf16.msra.mxu1 %v916_v11  ;;  %v919_v16 = vld [vmem:[%s1197_s3 + $0x18] sm:$0xff]   ;;  %v912_v18 = vld [vmem:[#allocation3 + $0x48] sm:$0xff]   ;;  %v915_v21 = vld [vmem:[#allocation3 + $0x60] ss:$0 sps:$4 sm:$0xff]   ;;  %p953_p8 = scmp.ne.s32.totalorder %s748_s13, %s952_s14 }
  0x1c   :  { %207 = vmatpush1.bf16.msra.mxu0 %v904_v3  ;;  %833 = vmatprep.subr.bf16.mxu1 %v917_v12  ;;  %v913_v19 = vld [vmem:[#allocation3 + $0x50] sm:$0xff]   ;;  %v914_v20 = vld [vmem:[#allocation3 + $0x58] sm:$0xff]   ;;  %v202_v24 = vsel %vm200_vm1, %v915_v21, 0  ;;  %v61_v25 = vld [vmem:[%s1194_s0 + $0x28] sm:$0xff] }
  0x1d   :  { %208 = vmatprep.subr.bf16.mxu0 %v981_v1  ;;  %v56_v22 = vld [vmem:[%s1194_s0] sm:$0xff]  ;;  %v58_v23 = vld [vmem:[%s1194_s0 + $0x10] sm:$0xff]  ;;  %v63_v26 = vld [vmem:[%s1194_s0 + $0x38] sm:$0xff] }
  0x1e   :  { %v72_v27 = vpack.c.bf16 %v58_v23, %v56_v22  ;;  %v75_v28 = vpack.c.bf16 %v63_v26, %v61_v25  ;;  %v60_v29 = vld [vmem:[%s1194_s0 + $0x20] sm:$0xff]  ;;  %v62_v30 = vld [vmem:[%s1194_s0 + $0x30] sm:$0xff]  ;;  %v65_v31 = vld [vmem:[%s1194_s0 + $0x48] sm:$0xff] }
  0x1f   :  { %834 = vmatpush3.bf16.msra.mxu1 %v917_v12  ;;  %v67_v32 = vld [vmem:[%s1194_s0 + $0x58] sm:$0xff]  ;;  %v74_v33 = vpack.c.bf16 %v62_v30, %v60_v29  ;;  %v64_v35 = vld [vmem:[%s1194_s0 + $0x40] sm:$0xff]  ;;  %v66_v36 = vld [vmem:[%s1194_s0 + $0x50] sm:$0xff] }
  0x20   :  { %209 = vmatpush1.bf16.msra.mxu0 %v905_v4  ;;  %835 = vmatprep.subr.bf16.mxu1 %v918_v14  ;;  %v77_v34 = vpack.c.bf16 %v67_v32, %v65_v31  ;;  %v69_v37 = vld [vmem:[%s1194_s0 + $0x68] sm:$0xff]  ;;  %v71_v38 = vld [vmem:[%s1194_s0 + $0x78] sm:$0xff]  ;;  %v76_v39 = vpack.c.bf16 %v66_v36, %v64_v35  ;;  %v68_v41 = vld [vmem:[%s1194_s0 + $0x60] sm:$0xff] }
  0x21   :  { %210 = vmatprep.subr.bf16.mxu0 %v981_v1  ;;  %v79_v40 = vpack.c.bf16 %v71_v38, %v69_v37  ;;  %v70_v42 = vld [vmem:[%s1194_s0 + $0x70] sm:$0xff]  ;;  %v920_v44 = vld [vmem:[%s1197_s3 + $0x20] sm:$0xff]   ;;  %v921_v45 = vld [vmem:[%s1197_s3 + $0x28] sm:$0xff]  }
  0x22   :  { %v78_v43 = vpack.c.bf16 %v70_v42, %v68_v41  ;;  %v922_v46 = vld [vmem:[%s1197_s3 + $0x30] sm:$0xff]   ;;  %v923_v47 = vld [vmem:[%s1197_s3 + $0x38] sm:$0xff]   ;;  %v924_v48 = vld [vmem:[%s1199_s5] sm:$0xff]  }
  0x23   :  { %836 = vmatpush3.bf16.msra.mxu1 %v918_v14  ;;  %v756_v49 = vld [vmem:[%s1196_s2] ss:$0 sm:$0xff]  ;;  %v925_v4 = vld [vmem:[%s1199_s5 + $0x8] sm:$0xff]   ;;  %v926_v23 = vld [vmem:[%s1199_s5 + $0x10] sm:$0xff]  }
  0x24   :  { %211 = vmatpush1.bf16.msra.mxu0 %v906_v5  ;;  %837 = vmatprep.subr.bf16.mxu1 %v919_v16  ;;  %v928_v25 = vld [vmem:[%s1201_s7] sm:$0xff]  }
  0x25   :  { %212 = vmatprep.subr.bf16.mxu0 %v981_v1  ;;  %v774_v26 = vld [vmem:[%s1198_s4] ss:$0 sm:$0xff] }
  0x27   :  { %838 = vmatpush3.bf16.msra.mxu1 %v919_v16 }
  0x28   :  { %213 = vmatpush1.bf16.msra.mxu0 %v907_v8  ;;  %839 = vmatprep.subr.bf16.mxu1 %v920_v44 }
  0x29   :  { %214 = vmatprep.subr.bf16.mxu0 %v981_v1 }
  0x2b   :  { %840 = vmatpush3.bf16.msra.mxu1 %v920_v44 }
  0x2c   :  { %215 = vmatpush1.bf16.msra.mxu0 %v908_v10  ;;  %841 = vmatprep.subr.bf16.mxu1 %v921_v45 }
  0x2d   :  { %216 = vmatprep.subr.bf16.mxu0 %v981_v1 }
  0x2f   :  { %842 = vmatpush3.bf16.msra.mxu1 %v921_v45 }
  0x30   :  { %217 = vmatpush1.bf16.msra.mxu0 %v909_v13  ;;  %843 = vmatprep.subr.bf16.mxu1 %v922_v46 }
  0x31   :  { %218 = vmatprep.subr.bf16.mxu0 %v981_v1 }
  0x33   :  { %844 = vmatpush3.bf16.msra.mxu1 %v922_v46 }
  0x34   :  { %219 = vmatpush1.bf16.msra.mxu0 %v910_v15  ;;  %845 = vmatprep.subr.bf16.mxu1 %v923_v47 }
  0x35   :  { %220 = vmatprep.subr.bf16.mxu0 %v981_v1 }
  0x37   :  { %846 = vmatpush3.bf16.msra.mxu1 %v923_v47 }
  0x38   :  { %221 = vmatpush1.bf16.msra.mxu0 %v911_v17  ;;  %855 = vmatprep.subr.bf16.mxu1 %v924_v48 }
  0x39   :  { %222 = vmatprep.subr.bf16.mxu0 %v981_v1 }
  0x3c   :  { %223 = vmatpush1.bf16.msra.mxu0 %v912_v18 }
  0x3d   :  { %224 = vmatprep.subr.bf16.mxu0 %v981_v1 }
  0x40   :  { %225 = vmatpush1.bf16.msra.mxu0 %v913_v19 }
  0x41   :  { %226 = vmatprep.subr.bf16.mxu0 %v981_v1 }
  0x44   :  { %227 = vmatpush1.bf16.msra.mxu0 %v914_v20 }
  0x45   :  { %228 = vmatprep.subr.bf16.mxu0 %v981_v1 }
  0x48   :  { %229 = vmatpush1.bf16.msra.mxu0 %v202_v24  ;;  %v927_v24 = vld [vmem:[%s1199_s5 + $0x18] sm:$0xff]  }
  0x4b   :  { %237 = vmatmul.mubr.bf16.vlgmr.msra.gmra.mrb[0].mxu0 %v72_v27 }
  0x4c   :  { %771 = vmatprep.mubr.msk.bf16.mxu0 %vm187_vm0, %v75_v28 }
  0x53   :  { %245 = vmatmul.mubr.bf16.gmra.mrb[4].mxu0 %v74_v33 }
  0x54   :  { %772 = vmatprep.mubr.msk.bf16.mxu0 %vm187_vm0, %v77_v34 }
  0x5b   :  { %253 = vmatmul.mubr.bf16.gmra.mrb[8].mxu0 %v76_v39 }
  0x5c   :  { %773 = vmatprep.mubr.msk.bf16.mxu0 %vm187_vm0, %v79_v40 }
  0x63   :  { %261 = vmatmul.mubr.bf16.gmra.mrb[12].mxu0 %v78_v43 }
 0x11e   :  { %v238_v50 = vpop.f32.mrb[0].mxu0 }
 0x11f   :  { %v239_v51 = vadd.f32 %v756_v49, %v238_v50  ;;  %v240_v52 = vpop.f32.mrb[1].mxu0 }
 0x120   :  { %v241_v53 = vpop.f32.mrb[2].mxu0 }
 0x121   :  { %v242_v54 = vadd.f32 %v756_v49, %v241_v53  ;;  %v243_v55 = vpop.f32.mrb[3].mxu0  ;;  %v269_v56 = vmax.f32 %v239_v51, 0.0 }
 0x122   :  { %v929_v55 = vld [vmem:[%s1201_s7 + $0x8] sm:$0xff]  }
 0x123   :  { %v270_v57 = vmax.f32 %v242_v54, 0.0 }
 0x125   :  { %v277_v58 = vpack.c.bf16 %v270_v57, %v269_v56  ;;  %v783_v56 = vld [vmem:[%s1200_s6] ss:$0 sm:$0xff] }
 0x126   :  { %v246_v59 = vpop.f32.mrb[4].mxu0 }
 0x127   :  { %v247_v60 = vadd.f32 %v756_v49, %v246_v59  ;;  %v248_v61 = vpop.f32.mrb[5].mxu0  ;;  %847 = vmatprep.mubr.bf16.mxu1 %v277_v58 }
 0x128   :  { %v249_v62 = vpop.f32.mrb[6].mxu0 }
 0x129   :  { %v250_v63 = vadd.f32 %v756_v49, %v249_v62  ;;  %v251_v0 = vpop.f32.mrb[7].mxu0  ;;  %v271_v1 = vmax.f32 %v247_v60, 0.0 }
 0x12b   :  { %v272_v2 = vmax.f32 %v250_v63, 0.0 }
 0x12d   :  { %v278_v3 = vpack.c.bf16 %v272_v2, %v271_v1 }
 0x12e   :  { %v254_v5 = vpop.f32.mrb[8].mxu0 }
 0x12f   :  { %v255_v6 = vadd.f32 %v756_v49, %v254_v5  ;;  %v256_v7 = vpop.f32.mrb[9].mxu0  ;;  %848 = vmatmul.mubr.bf16.vlgmr.msra.gmra.mrb[0].mxu1 %v278_v3 }
 0x130   :  { %v257_v8 = vpop.f32.mrb[10].mxu0  ;;  %856 = vmatpush3.bf16.msra.mxu1 %v924_v48 }
 0x131   :  { %v258_v9 = vadd.f32 %v756_v49, %v257_v8  ;;  %v259_v10 = vpop.f32.mrb[11].mxu0  ;;  %857 = vmatprep.subr.bf16.mxu1 %v925_v4  ;;  %v273_v11 = vmax.f32 %v255_v6, 0.0 }
 0x133   :  { %v274_v12 = vmax.f32 %v258_v9, 0.0 }
 0x134   :  { %858 = vmatpush3.bf16.msra.mxu1 %v925_v4 }
 0x135   :  { %v279_v13 = vpack.c.bf16 %v274_v12, %v273_v11  ;;  %859 = vmatprep.subr.bf16.mxu1 %v926_v23 }
 0x136   :  { %v262_v14 = vpop.f32.mrb[12].mxu0 }
 0x137   :  { %v263_v15 = vadd.f32 %v756_v49, %v262_v14  ;;  %v264_v16 = vpop.f32.mrb[13].mxu0  ;;  %851 = vmatprep.mubr.bf16.mxu1 %v279_v13 }
 0x138   :  { %v265_v17 = vpop.f32.mrb[14].mxu0  ;;  %860 = vmatpush3.bf16.msra.mxu1 %v926_v23  ;;  %v792_v23 = vld [vmem:[%s1202_s8] ss:$0 sm:$0xff] }
 0x139   :  { %v266_v18 = vadd.f32 %v756_v49, %v265_v17  ;;  %v267_v19 = vpop.f32.mrb[15].mxu0  ;;  %v275_v20 = vmax.f32 %v263_v15, 0.0  ;;  %861 = vmatprep.subr.bf16.mxu1 %v927_v24 }
 0x13b   :  { %v276_v21 = vmax.f32 %v266_v18, 0.0 }
 0x13c   :  { %862 = vmatpush3.bf16.msra.mxu1 %v927_v24 }
 0x13d   :  { %v280_v22 = vpack.c.bf16 %v276_v21, %v275_v20  ;;  %871 = vmatprep.subr.bf16.mxu1 %v928_v25  ;;  %v982_v21 = vmov 0.0  }
 0x13e   :  { %883 = vmatprep.subr.bf16.mxu0 %v982_v21  ;;  %891 = vmatprep.mubr.msk.bf16.mxu0 %vm983_vm4, %v982_v21 }
 0x13f   :  { %852 = vmatmul.mubr.bf16.gmra.mrb[4].mxu1 %v280_v22  ;;  %v728_v22 = vld [vmem:[#allocation2] sm:$0x1] }
 0x140   :  { %731 = vperm.xlu0 %902, %v728_v22  }
 0x202   :  { %v849_v27 = vpop.f32.mrb[0].mxu1 }
 0x203   :  { %v395_v28 = vadd.f32 %v849_v27, %v774_v26  ;;  %v386_v29 = vpop.f32.mrb[1].mxu1 }
 0x204   :  { %v387_v30 = vadd.f32 %v774_v26, %v386_v29  ;;  %v850_v31 = vpop.f32.mrb[2].mxu1 }
 0x205   :  { %v398_v32 = vadd.f32 %v850_v31, %v774_v26  ;;  %v389_v33 = vpop.f32.mrb[3].mxu1  ;;  %v419_v35 = vmax.f32 %v395_v28, 0.0 }
 0x206   :  { %v390_v34 = vadd.f32 %v774_v26, %v389_v33  ;;  %v417_v37 = vmax.f32 %v387_v30, 0.0 }
 0x207   :  { %v420_v36 = vmax.f32 %v398_v32, 0.0 }
 0x208   :  { %v418_v38 = vmax.f32 %v390_v34, 0.0 }
 0x209   :  { %v426_v39 = vpack.c.bf16 %v420_v36, %v419_v35 }
 0x20a   :  { %v425_v40 = vpack.c.bf16 %v418_v38, %v417_v37 }
 0x20c   :  { %863 = vmatprep.mubr.msk.bf16.mxu1 %vm468_vm2, %v425_v40 }
 0x20d   :  { %864 = vmatmul.mubr.msk.bf16.vlgmr.msra.gmra.mrb[8].mxu1 %vm468_vm2, %v426_v39 }
 0x20e   :  { %872 = vmatpush3.bf16.msra.mxu1 %v928_v25 }
 0x20f   :  { %873 = vmatprep.subr.bf16.mxu1 %v929_v55 }
 0x212   :  { %v853_v41 = vpop.f32.mrb[4].mxu1  ;;  %874 = vmatpush3.bf16.msra.mxu1 %v929_v55 }
 0x213   :  { %v411_v42 = vadd.f32 %v853_v41, %v774_v26  ;;  %v402_v43 = vpop.f32.mrb[5].mxu1 }
 0x214   :  { %v403_v44 = vadd.f32 %v774_v26, %v402_v43  ;;  %v854_v45 = vpop.f32.mrb[6].mxu1 }
 0x215   :  { %v414_v46 = vadd.f32 %v854_v45, %v774_v26  ;;  %v405_v47 = vpop.f32.mrb[7].mxu1  ;;  %v423_v49 = vmax.f32 %v411_v42, 0.0 }
 0x216   :  { %v406_v48 = vadd.f32 %v774_v26, %v405_v47  ;;  %v421_v51 = vmax.f32 %v403_v44, 0.0 }
 0x217   :  { %v424_v50 = vmax.f32 %v414_v46, 0.0 }
 0x218   :  { %v422_v52 = vmax.f32 %v406_v48, 0.0 }
 0x219   :  { %v428_v53 = vpack.c.bf16 %v424_v50, %v423_v49 }
 0x21a   :  { %v427_v54 = vpack.c.bf16 %v422_v52, %v421_v51 }
 0x21c   :  { %867 = vmatprep.mubr.msk.bf16.mxu1 %vm468_vm2, %v427_v54 }
 0x21d   :  { %868 = vmatmul.mubr.msk.bf16.gmra.mrb[12].mxu1 %vm468_vm2, %v428_v53 }
 0x2e0   :  { %v865_v57 = vpop.f32.mrb[8].mxu1 }
 0x2e1   :  { %v524_v58 = vadd.f32 %v865_v57, %v783_v56  ;;  %v515_v59 = vpop.f32.mrb[9].mxu1  ;;  %v734_v57 = vlaneseq }
 0x2e2   :  { %v516_v60 = vadd.f32 %v783_v56, %v515_v59  ;;  %v866_v61 = vpop.f32.mrb[10].mxu1 }
 0x2e3   :  { %v527_v62 = vadd.f32 %v866_v61, %v783_v56  ;;  %v518_v63 = vpop.f32.mrb[11].mxu1  ;;  %v548_v1 = vmax.f32 %v524_v58, 0.0  ;;  %v735_v58 = vshrl.u32 %v734_v57, 7 }
 0x2e4   :  { %v519_v0 = vadd.f32 %v783_v56, %v518_v63  ;;  %v546_v3 = vmax.f32 %v516_v60, 0.0  ;;  %v732_v60 = vpop.permute.xlu0 %731 }
 0x2e5   :  { %v549_v2 = vmax.f32 %v527_v62, 0.0  ;;  %v736_v59 = vsub.s32 0, %v735_v58 }
 0x2e6   :  { %v547_v4 = vmax.f32 %v519_v0, 0.0 }
 0x2e7   :  { %v555_v5 = vpack.c.bf16 %v549_v2, %v548_v1  ;;  %v737_v61 = vrot.slane %v732_v60, %v736_v59 }
 0x2e8   :  { %v554_v6 = vpack.c.bf16 %v547_v4, %v546_v3 }
 0x2ea   :  { %875 = vmatprep.mubr.msk.bf16.mxu1 %vm581_vm3, %v554_v6 }
 0x2eb   :  { %876 = vmatmul.mubr.msk.bf16.vlgmr.msra.gmra.mrb[16].mxu1 %vm581_vm3, %v555_v5 }
 0x2f0   :  { %v869_v7 = vpop.f32.mrb[12].mxu1 }
 0x2f1   :  { %v540_v8 = vadd.f32 %v869_v7, %v783_v56  ;;  %v531_v9 = vpop.f32.mrb[13].mxu1 }
 0x2f2   :  { %v532_v10 = vadd.f32 %v783_v56, %v531_v9  ;;  %v870_v11 = vpop.f32.mrb[14].mxu1 }
 0x2f3   :  { %v543_v12 = vadd.f32 %v870_v11, %v783_v56  ;;  %v534_v13 = vpop.f32.mrb[15].mxu1  ;;  %v552_v15 = vmax.f32 %v540_v8, 0.0 }
 0x2f4   :  { %v535_v14 = vadd.f32 %v783_v56, %v534_v13  ;;  %v550_v17 = vmax.f32 %v532_v10, 0.0  ;;  %v667_v56 = vld [vmem:[%s1203_s9] sm:$0xf]  ;;  %s956_s9 = scalar_lea.vmem %s748_s13, 32 }
 0x2f5   :  { %v553_v16 = vmax.f32 %v543_v12, 0.0  ;;  %p958_p10 = scmp.lt.s32.totalorder %s956_s9, %s952_s14 }
 0x2f6   :  { %v551_v18 = vmax.f32 %v535_v14, 0.0 }
 0x2f7   :  { %v557_v19 = vpack.c.bf16 %v553_v16, %v552_v15  ;;  %p959_p11 = por %p958_p10, %p957_p9 }
 0x2f8   :  { %v556_v20 = vpack.c.bf16 %v551_v18, %v550_v17 }
 0x2f9   :  { %p960_p12 = pnand %p959_p11, %p953_p8 }
 0x2fa   :  { %879 = vmatprep.mubr.msk.bf16.mxu1 %vm581_vm3, %v556_v20 }
 0x2fb   :  { %880 = vmatmul.mubr.msk.bf16.gmra.mrb[20].mxu1 %vm581_vm3, %v557_v19 }
 0x3be   :  { %v877_v24 = vpop.f32.mrb[16].mxu1 }
 0x3bf   :  { %v637_v25 = vadd.f32 %v877_v24, %v792_v23  ;;  %v628_v26 = vpop.f32.mrb[17].mxu1 }
 0x3c0   :  { %v629_v27 = vadd.f32 %v792_v23, %v628_v26  ;;  %v878_v28 = vpop.f32.mrb[18].mxu1 }
 0x3c1   :  { %v640_v29 = vadd.f32 %v878_v28, %v792_v23  ;;  %v631_v30 = vpop.f32.mrb[19].mxu1  ;;  %v661_v32 = vmax.f32 %v637_v25, 0.0 }
 0x3c2   :  { %v632_v31 = vadd.f32 %v792_v23, %v631_v30  ;;  %v659_v34 = vmax.f32 %v629_v27, 0.0 }
 0x3c3   :  { %v662_v33 = vmax.f32 %v640_v29, 0.0 }
 0x3c4   :  { %v660_v35 = vmax.f32 %v632_v31, 0.0 }
 0x3c5   :  { %v669_v36 = vpack.c.bf16 %v662_v33, %v661_v32 }
 0x3c6   :  { %v668_v37 = vpack.c.bf16 %v660_v35, %v659_v34 }
 0x3c7   :  { %v680_v44 = vsel %vm672_vm5, %v669_v36, 0 }
 0x3c8   :  { %v677_v38 = vsel %vm672_vm5, %v668_v37, 0 }
 0x3c9   :  { %884 = vmatpush3.bf16.xpose.msra.mxu0 %v677_v38 }
 0x3ca   :  { %885 = vmatprep.subr.bf16.mxu0 %v982_v21 }
 0x3ce   :  { %v881_v39 = vpop.f32.mrb[20].mxu1 }
 0x3cf   :  { %v653_v40 = vadd.f32 %v881_v39, %v792_v23  ;;  %v644_v41 = vpop.f32.mrb[21].mxu1 }
 0x3d0   :  { %v645_v42 = vadd.f32 %v792_v23, %v644_v41  ;;  %v882_v43 = vpop.f32.mrb[22].mxu1 }
 0x3d1   :  { %v656_v45 = vadd.f32 %v882_v43, %v792_v23  ;;  %v647_v46 = vpop.f32.mrb[23].mxu1  ;;  %886 = vmatpush3.bf16.xpose.msra.mxu0 %v680_v44  ;;  %v665_v48 = vmax.f32 %v653_v40, 0.0 }
 0x3d2   :  { %v648_v47 = vadd.f32 %v792_v23, %v647_v46  ;;  %887 = vmatprep.subr.bf16.mxu0 %v982_v21  ;;  %v663_v50 = vmax.f32 %v645_v42, 0.0 }
 0x3d3   :  { %v666_v49 = vmax.f32 %v656_v45, 0.0 }
 0x3d4   :  { %v664_v51 = vmax.f32 %v648_v47, 0.0 }
 0x3d5   :  { %v671_v52 = vpack.c.bf16 %v666_v49, %v665_v48 }
 0x3d6   :  { %v670_v53 = vpack.c.bf16 %v664_v51, %v663_v50 }
 0x3d7   :  { %v686_v55 = vsel %vm672_vm5, %v671_v52, 0 }
 0x3d8   :  { %v683_v54 = vsel %vm672_vm5, %v670_v53, 0 }
 0x3d9   :  { %888 = vmatpush3.bf16.xpose.msra.mxu0 %v683_v54 }
 0x3da   :  { %889 = vmatprep.subr.bf16.mxu0 %v982_v21 }
 0x3e1   :  { %890 = vmatpush3.bf16.xpose.msra.mxu0 %v686_v55 }
 0x3e8   :  { %892 = vmatmul.mubr.msk.bf16.vlgmr.msra.gmra.mrb[16].mxu0 %vm672_vm5, %v667_v56 }
 0x4bb   :  { %v722_v62 = vpop.f32.mrb[16].mxu0 }
 0x4bc   :  { %v738_v63 = vadd.f32 %v737_v61, %v722_v62  ;;  %v893_v0 = vpop.f32.mrb[17].mxu0 }
 0x4bd   :  { %v725_v1 = vpop.f32.mrb[18].mxu0 }
 0x4be   :  { %v894_v2 = vpop.f32.mrb[19].mxu0  ;;  %740 = vst.msk [vmem:[#allocation6] sm:$0x1] %vm739_vm6, %v738_v63 }
 0x4bf   :  { %963 = shalt.err (!%p960_p12)
}
 0x4c0   :  { %s964_s0 = scalar_lea.hbm %s1205_s11, 16 }
 0x4c1   :  { %p965_p13 = scmp.ne.s32.totalorder %s1205_s11, %s964_s0  ;;  %p968_p0 = scmp.lt.u32.totalorder %s964_s0, %s1205_s11 }
 0x4c3   :  { %p970_p1 = pnand %p968_p0, %p965_p13 }
 0x4c5   :  { %973 = shalt.err (!%p970_p1)
}
 0x4c6   :  { %750 = dma.vmem_to_hbm [thread:$0]  %s748_s13, 16, %s1205_s11, [#allocation5]  }
 0x4c7   :  { %976 = dma.done.wait [#allocation5], 16  }
 0x4c8   :  { %977 = vsyncadd [#allocation5], 4294967280 }
 0x4c9   :  { %754 = vsyncpa [#allocation4], 1 }
 0x4ca   :  { %755 = vsyncpa [#allocation5], 1 }

</bundles_post_ra>
